<compile_context>
chip_gen: v6e
topology: v6e:2x2x1
jax: 0.10.0
libtpu: 0.0.40
codegen_flags: <defaults>
</compile_context>

<pallas_src>
import functools

import jax
import jax.numpy as jnp
from jax import lax
from jax.experimental import pallas as pl
from jax.experimental.pallas import tpu as pltpu

_NEG = -1e30  # finite "masked out" fill (ReLU output >= 0, so any valid row wins the max)


def _round_up(x, m):
    return (x + m - 1) // m * m


def _predict(pooled, params_ref, out_size):
    """Predictor Linear from the packed params slab.

    Slab layout: row 0 = b1, rows 1..O = w2 (lane-dense), row 1+O = b2 (first O lanes).
    """
    w2 = params_ref[1:1 + out_size, :]                       # (O, H)
    b2 = params_ref[1 + out_size:2 + out_size, 0:out_size]   # (1, O)
    if out_size == 1:
        # VPU multiply + XLU lane reduce: no degenerate (H,1) MXU matmul.
        risk = jnp.sum(pooled * w2, axis=-1, keepdims=True)
    else:
        # Lane-dense RHS (O, H); contract the shared last dim on the MXU.
        risk = lax.dot_general(pooled, w2, (((1,), (1,)), ((), ())),
                               preferred_element_type=jnp.float32)
    return risk + b2


def _project_pool(x, w1t, params_ref, num_instances, mask_bias=None):
    # Projection: one lane-dense (B*N, F) @ (F, H) bf16 matmul, f32 accumulation.
    h = jnp.dot(x, w1t, preferred_element_type=jnp.float32)       # (B*N, H) f32
    h = jnp.maximum(h + params_ref[0:1, :], 0.0)
    # TODO(synk): training-mode nn.Dropout not implemented (Identity at inference).
    if mask_bias is not None:
        h = h + mask_bias                                          # 0 / -1e30, one VPU add
    b = h.shape[0] // num_instances
    # Last dim unchanged -> layout-preserving sublane split, then sublane max.
    return jnp.max(h.reshape(b, num_instances, h.shape[1]), axis=1)  # (B, H)


def _mpb_kernel_unmasked(x_ref, w1_ref, params_ref, o_ref, *, num_instances, out_size):
    pooled = _project_pool(x_ref[...], w1_ref[...], params_ref, num_instances)
    o_ref[...] = _predict(pooled, params_ref, out_size)


def _mpb_kernel_masked(x_ref, bias_ref, w1_ref, params_ref, o_ref, *,
                       num_instances, out_size):
    pooled = _project_pool(x_ref[...], w1_ref[...], params_ref, num_instances,
                           mask_bias=bias_ref[...])
    o_ref[...] = _predict(pooled, params_ref, out_size)


@jax.jit
def maxpooling_block(h, w1, b1, w2, b2, mask=None):
    """h: (B, N, F); w1: (H, F); b1: (H,); w2: (O, H); b2: (O,); mask: (B, N) or None."""
    B, N, F = h.shape
    H = w1.shape[0]
    O = w2.shape[0]

    # Pad N to a multiple of 8 so the in-kernel reshape is a pure sublane split.
    Np = _round_up(N, 8)
    if Np != N:
        h = jnp.pad(h, ((0, 0), (0, Np - N), (0, 0)))
        if mask is None:
            mask = jnp.concatenate(
                [jnp.ones((B, N), jnp.float32),
                 jnp.zeros((B, Np - N), jnp.float32)], axis=1)
        else:
            mask = jnp.pad(mask.astype(jnp.float32), ((0, 0), (0, Np - N)))
    rows = B * Np

    # bf16 operands for the MXU's native path (accumulation stays f32 in-kernel).
    x2 = h.reshape(rows, F).astype(jnp.bfloat16)
    w1t = jnp.asarray(w1, jnp.bfloat16).T                          # (F, H)

    # Pack all tiny f32 operands into one (P, H) slab -> a single DMA.
    P = _round_up(2 + O, 8)
    params = jnp.zeros((P, H), jnp.float32)
    params = params.at[0, :].set(jnp.asarray(b1, jnp.float32))
    params = params.at[1:1 + O, :].set(jnp.asarray(w2, jnp.float32))
    params = params.at[1 + O, :O].set(jnp.asarray(b2, jnp.float32))

    common = dict(
        out_shape=jax.ShapeDtypeStruct((B, O), jnp.float32),
        grid=(1,),  # whole (tiny) batch in one step; re-tile rows if B*N grows
        out_specs=pl.BlockSpec((B, O), lambda i: (0, 0)),
        compiler_params=pltpu.CompilerParams(
            dimension_semantics=("arbitrary",)),
    )

    if mask is None:
        kernel = functools.partial(_mpb_kernel_unmasked,
                                   num_instances=Np, out_size=O)
        return pl.pallas_call(
            kernel,
            in_specs=[
                pl.BlockSpec((rows, F), lambda i: (0, 0)),   # activations (bf16)
                pl.BlockSpec((F, H), lambda i: (0, 0)),      # projection W^T (bf16)
                pl.BlockSpec((P, H), lambda i: (0, 0)),      # packed b1/w2/b2 slab (f32)
            ],
            **common,
        )(x2, w1t, params)

    # Additive mask bias: 0 (valid) / -1e30 (padding) -> one add in the kernel.
    mbias = jnp.where(mask.reshape(rows, 1) > 0, 0.0, _NEG).astype(jnp.float32)
    kernel = functools.partial(_mpb_kernel_masked,
                               num_instances=Np, out_size=O)
    return pl.pallas_call(
        kernel,
        in_specs=[
            pl.BlockSpec((rows, F), lambda i: (0, 0)),       # activations (bf16)
            pl.BlockSpec((rows, 1), lambda i: (0, 0)),       # additive mask bias (f32)
            pl.BlockSpec((F, H), lambda i: (0, 0)),          # projection W^T (bf16)
            pl.BlockSpec((P, H), lambda i: (0, 0)),          # packed b1/w2/b2 slab (f32)
        ],
        **common,
    )(x2, mbias, w1t, params)


def ref_forward(h, w1, b1, w2, b2, mask=None, cast_bf16=False):
    """Pure-JAX reference matching the torch module's forward."""
    if cast_bf16:  # mimic kernel numerics (bf16 inputs, f32 accumulation)
        h = h.astype(jnp.bfloat16).astype(jnp.float32)
        w1 = w1.astype(jnp.bfloat16).astype(jnp.float32)
    p = jax.nn.relu(jnp.einsum('bnf,hf->bnh', h, w1) + b1)
    if mask is not None:
        p = jnp.where(mask[..., None] > 0, p, -jnp.inf)
    pooled = jnp.max(p, axis=1)
    return jnp.einsum('bh,oh->bo', pooled, w2) + b2


if __name__ == "__main__":
    # Small shapes implied by the module: (batch, num_instances, input_size).
    B, N, F = 2, 8, 32
    H = 128          # hidden_size (lane-dense intermediate)
    O = 1            # output_size (cox risk score)

    key = jax.random.PRNGKey(0)
    k1, k2, k3, k4, k5, k6 = jax.random.split(key, 6)
    x = jax.random.normal(k1, (B, N, F), jnp.float32)
    w1 = 0.2 * jax.random.normal(k2, (H, F), jnp.float32)    # torch Linear weight
    b1 = 0.1 * jax.random.normal(k3, (H,), jnp.float32)
    w2 = 0.2 * jax.random.normal(k4, (O, H), jnp.float32)
    b2 = 0.1 * jax.random.normal(k5, (O,), jnp.float32)
    # Binary instance mask (1=valid, 0=padding); every bag keeps >=1 instance.
    mask = (jax.random.uniform(k6, (B, N)) > 0.3).astype(jnp.float32)
    mask = mask.at[:, 0].set(1.0)

    # Masked path.
    out = jax.block_until_ready(maxpooling_block(x, w1, b1, w2, b2, mask))
    assert out.shape == (B, O)
    # Tight check against a bf16-input-matched reference (kernel numerics).
    exp_bf = ref_forward(x, w1, b1, w2, b2, mask, cast_bf16=True)
    assert jnp.allclose(out, exp_bf, atol=1e-3, rtol=1e-3)
    # Loose check against the full-f32 reference (bf16 input rounding).
    exp = ref_forward(x, w1, b1, w2, b2, mask)
    assert jnp.allclose(out, exp, atol=5e-2, rtol=5e-2)

    # Unmasked path (mask=None, specialized kernel without the mask input).
    out2 = jax.block_until_ready(maxpooling_block(x, w1, b1, w2, b2))
    assert jnp.allclose(out2, ref_forward(x, w1, b1, w2, b2, cast_bf16=True),
                        atol=1e-3, rtol=1e-3)
    assert jnp.allclose(out2, ref_forward(x, w1, b1, w2, b2),
                        atol=5e-2, rtol=5e-2)

    # N not a multiple of 8: exercises the wrapper-side padding path.
    x3 = jax.random.normal(k6, (B, 5, F), jnp.float32)
    out3 = jax.block_until_ready(maxpooling_block(x3, w1, b1, w2, b2))
    assert jnp.allclose(out3, ref_forward(x3, w1, b1, w2, b2, cast_bf16=True),
                        atol=1e-3, rtol=1e-3)

    print("KERNEL_OK")
</pallas_src>

<mosaic_0001>
module attributes {stable_mosaic.version = 11 : i64} {
  func.func @_mpb_kernel_masked(%arg0: i32, %arg1: memref<16x32xbf16, #tpu.memory_space<vmem>>, %arg2: memref<16x1xf32, #tpu.memory_space<vmem>>, %arg3: memref<32x128xbf16, #tpu.memory_space<vmem>>, %arg4: memref<8x128xf32, #tpu.memory_space<vmem>>, %arg5: memref<2x1xf32, #tpu.memory_space<vmem>>) attributes {dimension_semantics = [#tpu.dimension_semantics<arbitrary>], iteration_bounds = array<i64: 1>, scalar_prefetch = 0 : i64, scratch_operands = 0 : i64, tpu.core_type = #tpu.core_type<tc>, window_params = [{pipeline_mode = #tpu.pipeline_mode<synchronous>, transform_indices = @transform_0, window_bounds = array<i64: 16, 32>}, {pipeline_mode = #tpu.pipeline_mode<synchronous>, transform_indices = @transform_1, window_bounds = array<i64: 16, 1>}, {pipeline_mode = #tpu.pipeline_mode<synchronous>, transform_indices = @transform_2, window_bounds = array<i64: 32, 128>}, {pipeline_mode = #tpu.pipeline_mode<synchronous>, transform_indices = @transform_3, window_bounds = array<i64: 8, 128>}, {pipeline_mode = #tpu.pipeline_mode<synchronous>, transform_indices = @transform_4, window_bounds = array<i64: 2, 1>}]} {
    %c0 = arith.constant 0 : index
    %c0_0 = arith.constant 0 : index
    %0 = vector.load %arg1[%c0, %c0_0] : memref<16x32xbf16, #tpu.memory_space<vmem>>, vector<16x32xbf16>
    %c0_1 = arith.constant 0 : index
    %c0_2 = arith.constant 0 : index
    %1 = vector.load %arg3[%c0_1, %c0_2] : memref<32x128xbf16, #tpu.memory_space<vmem>>, vector<32x128xbf16>
    %c0_3 = arith.constant 0 : index
    %c0_4 = arith.constant 0 : index
    %2 = vector.load %arg2[%c0_3, %c0_4] : memref<16x1xf32, #tpu.memory_space<vmem>>, vector<16x1xf32>
    %cst = arith.constant dense<0.000000e+00> : vector<16x128xf32>
    %3 = tpu.matmul %0, %1, %cst {dimension_numbers = #tpu.dot_dimension_numbers<[1], [0], [0], [1], [0, 0, 1, 1], [], []>} : vector<16x32xbf16>, vector<32x128xbf16>, vector<16x128xf32> -> vector<16x128xf32>
    %c0_5 = arith.constant 0 : index
    %c0_6 = arith.constant 0 : index
    %4 = vector.load %arg4[%c0_5, %c0_6] : memref<8x128xf32, #tpu.memory_space<vmem>>, vector<1x128xf32>
    %5 = vector.broadcast %4 : vector<1x128xf32> to vector<16x128xf32>
    %6 = arith.addf %3, %5 : vector<16x128xf32>
    %cst_7 = arith.constant 0.000000e+00 : f32
    %7 = vector.broadcast %cst_7 : f32 to vector<16x128xf32>
    %8 = arith.maximumf %6, %7 : vector<16x128xf32>
    %9 = vector.broadcast %2 : vector<16x1xf32> to vector<16x128xf32>
    %10 = arith.addf %8, %9 : vector<16x128xf32>
    %11 = vector.shape_cast %10 : vector<16x128xf32> to vector<2x8x128xf32>
    %cst_8 = arith.constant dense<0xFF800000> : vector<2x128xf32>
    %12 = vector.multi_reduction <maximumf>, %11, %cst_8 [1] : vector<2x8x128xf32> to vector<2x128xf32>
    %c1 = arith.constant 1 : index
    %c0_9 = arith.constant 0 : index
    %13 = vector.load %arg4[%c1, %c0_9] : memref<8x128xf32, #tpu.memory_space<vmem>>, vector<1x128xf32>
    %c2 = arith.constant 2 : index
    %c0_10 = arith.constant 0 : index
    %14 = vector.load %arg4[%c2, %c0_10] : memref<8x128xf32, #tpu.memory_space<vmem>>, vector<1x1xf32>
    %15 = vector.broadcast %13 : vector<1x128xf32> to vector<2x128xf32>
    %16 = arith.mulf %12, %15 : vector<2x128xf32>
    %cst_11 = arith.constant dense<0.000000e+00> : vector<2xf32>
    %17 = vector.multi_reduction <add>, %16, %cst_11 [1] : vector<2x128xf32> to vector<2xf32>
    %18 = vector.shape_cast %17 : vector<2xf32> to vector<2x1xf32>
    %19 = vector.broadcast %14 : vector<1x1xf32> to vector<2x1xf32>
    %20 = arith.addf %18, %19 : vector<2x1xf32>
    %c0_12 = arith.constant 0 : index
    %c0_13 = arith.constant 0 : index
    %21 = vector.load %arg5[%c0_12, %c0_13] : memref<2x1xf32, #tpu.memory_space<vmem>>, vector<2x1xf32>
    tpu.vector_store %arg5[%c0_12, %c0_13], %20 {strides = array<i32>} : memref<2x1xf32, #tpu.memory_space<vmem>>, vector<2x1xf32>,
    return
  }
  func.func @transform_0(%arg0: i32) -> (i32, i32) {
    %c0_i32 = arith.constant 0 : i32
    %c0_i32_0 = arith.constant 0 : i32
    %c0_i32_1 = arith.constant 0 : i32
    return %c0_i32, %c0_i32_0 : i32, i32
  }
  func.func @transform_1(%arg0: i32) -> (i32, i32) {
    %c0_i32 = arith.constant 0 : i32
    %c0_i32_0 = arith.constant 0 : i32
    %c0_i32_1 = arith.constant 0 : i32
    return %c0_i32, %c0_i32_0 : i32, i32
  }
  func.func @transform_2(%arg0: i32) -> (i32, i32) {
    %c0_i32 = arith.constant 0 : i32
    %c0_i32_0 = arith.constant 0 : i32
    %c0_i32_1 = arith.constant 0 : i32
    return %c0_i32, %c0_i32_0 : i32, i32
  }
  func.func @transform_3(%arg0: i32) -> (i32, i32) {
    %c0_i32 = arith.constant 0 : i32
    %c0_i32_0 = arith.constant 0 : i32
    %c0_i32_1 = arith.constant 0 : i32
    return %c0_i32, %c0_i32_0 : i32, i32
  }
  func.func @transform_4(%arg0: i32) -> (i32, i32) {
    %c0_i32 = arith.constant 0 : i32
    %c0_i32_0 = arith.constant 0 : i32
    %c0_i32_1 = arith.constant 0 : i32
    return %c0_i32, %c0_i32_0 : i32, i32
  }
}

</mosaic_0001>

<bundles_post_ra>
// kernel: maxpooling_block.1
= control target key start
LH: loop header
LB: loop body
LE: loop exit
PB: predicated region body
PF: predicated region fallthrough
CT: control target
= control target key end

     0   :  { %v173_v0 = vmov 0.0   ;;  %vm174_vm0 = vmmov 0   ;;  %v175_v2 = vmov 0   ;;  %vm48_vm1 = vcmask 261120   ;;  %s228_s2 = inlined_call_operand.vmem [shape: bf16[32,128], index: 2, kind: input, shape index: {}]   ;;  %s229_s1 = inlined_call_operand.vmem [shape: f32[16,1], index: 1, kind: input, shape index: {}]   ;;  %s230_s0 = inlined_call_operand.vmem [shape: bf16[16,32], index: 0, kind: input, shape index: {}]   ;;  %s231_s3 = inlined_call_operand.vmem [shape: f32[8,128], index: 3, kind: input, shape index: {}]   ;;  %s232_s4 = inlined_call_operand.vmem [shape: f32[2,1], index: 4, kind: output, shape index: {}]  }
   0x1   :  { %158 = vmatprep.subr.bf16.mxu0 %v173_v0  ;;  %v170_v1 = vld [vmem:[%s228_s2 + $0x8] sm:$0xff]   ;;  %162 = vmatprep.mubr.msk.bf16.mxu0 %vm174_vm0, %v173_v0  ;;  %v171_v3 = vld [vmem:[%s228_s2] sm:$0xff]   ;;  %vm130_vm2 = vcmask 1041409   ;;  %vm133_vm3 = vcmask 1041408   ;;  %vm142_vm4 = vcmask 1024  }
   0x2   :  { %169 = vset.pattern.permute.xlu0 %v175_v2  ;;  %159 = vmatpush3.bf16.msra.mxu0 %v170_v1  ;;  %v25_v4 = vld [vmem:[%s229_s1 + $0x8] sm:$0xff]  ;;  %v172_v5 = vld [vmem:[%s230_s0] sm:$0xff]  }
   0x3   :  { %160 = vmatprep.subr.bf16.mxu0 %v173_v0  ;;  %102 = vperm.xlu0 %169, %v25_v4   ;;  %v24_v6 = vld [vmem:[%s229_s1] sm:$0xff] }
   0x4   :  { %v148_v8 = vld [vmem:[%s231_s3] ss:$0 sm:$0xff]  ;;  %v153_v32 = vld [vmem:[%s231_s3 + $0x1] ss:$0 sm:$0xff]  ;;  %v154_v38 = vld [vmem:[%s231_s3 + $0x2] ss:$0 sm:$0xff] }
   0x6   :  { %161 = vmatpush3.bf16.msra.mxu0 %v171_v3 }
   0x7   :  { %97 = vperm.xlu0 %169, %v24_v6  }
   0x9   :  { %163 = vmatmul.mubr.msk.bf16.vlgmr.msra.gmra.mxu0 %vm48_vm1, %v172_v5 }
  0x7e   :  { %v103_v7 = vpop.permute.xlu0 %102 }
  0x82   :  { %v98_v12 = vpop.permute.xlu0 %97 }
  0xc9   :  { %v86_v9 = vpop.f32.mrf.mxu0 }
  0xca   :  { %v87_v10 = vadd.f32 %v148_v8, %v86_v9 }
  0xcb   :  { %v164_v11 = vpop.f32.mrf.mxu0 }
  0xcc   :  { %v93_v13 = vmax.f32 %v87_v10, 0.0 }
  0xcd   :  { %v89_v14 = vpop.f32.mrf.mxu0 }
  0xce   :  { %v105_v15 = vadd.f32 %v98_v12, %v93_v13  ;;  %v90_v16 = vadd.f32 %v148_v8, %v89_v14 }
  0xcf   :  { %v165_v17 = vpop.f32.mrf.mxu0 }
  0xd0   :  { %v107_v18 = vrot.slane %v105_v15, 4  ;;  %v94_v19 = vmax.f32 %v90_v16, 0.0 }
  0xd2   :  { %v108_v20 = vmax.f32 %v105_v15, %v107_v18  ;;  %v106_v21 = vadd.f32 %v103_v7, %v94_v19 }
  0xd4   :  { %v109_v22 = vrot.slane %v108_v20, 2  ;;  %v113_v23 = vrot.slane %v106_v21, 4 }
  0xd6   :  { %v110_v24 = vmax.f32 %v108_v20, %v109_v22  ;;  %v114_v25 = vmax.f32 %v106_v21, %v113_v23 }
  0xd8   :  { %v115_v26 = vrot.slane %v114_v25, 2  ;;  %v111_v27 = vrot.slane %v110_v24, 1 }
  0xda   :  { %v116_v28 = vmax.f32 %v114_v25, %v115_v26  ;;  %v112_v30 = vmax.f32 %v110_v24, %v111_v27 }
  0xdc   :  { %v117_v29 = vrot.slane %v116_v28, 1  ;;  %v125_v34 = vmul.f32 %v153_v32, %v112_v30 }
  0xde   :  { %v118_v31 = vmax.f32 %v116_v28, %v117_v29 }
  0xe0   :  { %v126_v33 = vmul.f32 %v153_v32, %v118_v31 }
  0xe2   :  { %v129_v35 = vrot.slane %v126_v33, 7 }
  0xe4   :  { %v131_v36 = vsel %vm130_vm2, %v129_v35, %v125_v34 }
  0xe5   :  { %v134_v37 = vsel %vm133_vm3, %v131_v36, 0.0 }
  0xe6   :  { %135 = vadd.xlane.f32.xlu1 %v134_v37 }
 0x16f   :  { %v136_v39 = vpop.xlane.xlu1 %135 }
 0x170   :  { %v141_v40 = vadd.f32 %v154_v38, %v136_v39 }
 0x172   :  { %143 = vst.msk [vmem:[%s232_s4] sm:$0x3] %vm142_vm4, %v141_v40 }

</bundles_post_ra>
